<compile_context>
chip_gen: v6e
topology: v6e:2x2x1
jax: 0.10.0
libtpu: 0.0.40
codegen_flags: <defaults>
</compile_context>

<pallas_src>
import functools

import jax
import jax.numpy as jnp
from jax.experimental import pallas as pl
from jax.experimental.pallas import tpu as pltpu

# ----------------------------------------------------------------------------
# Pallas kernels
# ----------------------------------------------------------------------------


def _round_up(x, m):
    return ((x + m - 1) // m) * m


def _epilogue(acc, b_ref, res, relu, o_ref):
    out = acc + b_ref[...]                       # BN scale folded into weights
    if res is not None:
        out = out + res                          # fused residual add (f32)
    if relu:
        out = jnp.maximum(out, 0.0)
    o_ref[...] = out.astype(o_ref.dtype)


# --- single K-step kernels (whole contraction in one dot, no scratch) --------

def _mm_kernel(x_ref, w_ref, b_ref, o_ref, *, relu):
    acc = jnp.dot(x_ref[...], w_ref[...], preferred_element_type=jnp.float32)
    _epilogue(acc, b_ref, None, relu, o_ref)


def _mm_res_kernel(x_ref, w_ref, b_ref, r_ref, o_ref, *, relu):
    acc = jnp.dot(x_ref[...], w_ref[...], preferred_element_type=jnp.float32)
    _epilogue(acc, b_ref, r_ref[...].astype(jnp.float32), relu, o_ref)


# --- K-blocked kernels (large contractions, f32 VMEM accumulator) ------------

def _mm_kblk_kernel(x_ref, w_ref, b_ref, o_ref, acc_ref, *, relu):
    k = pl.program_id(2)

    @pl.when(k == 0)
    def _():
        acc_ref[...] = jnp.zeros_like(acc_ref)

    acc_ref[...] += jnp.dot(x_ref[...], w_ref[...],
                            preferred_element_type=jnp.float32)

    @pl.when(k == pl.num_programs(2) - 1)
    def _():
        _epilogue(acc_ref[...], b_ref, None, relu, o_ref)


def _mm_res_kblk_kernel(x_ref, w_ref, b_ref, r_ref, o_ref, acc_ref, *, relu):
    k = pl.program_id(2)

    @pl.when(k == 0)
    def _():
        acc_ref[...] = jnp.zeros_like(acc_ref)

    acc_ref[...] += jnp.dot(x_ref[...], w_ref[...],
                            preferred_element_type=jnp.float32)

    @pl.when(k == pl.num_programs(2) - 1)
    def _():
        _epilogue(acc_ref[...], b_ref, r_ref[...].astype(jnp.float32), relu,
                  o_ref)


def _matmul_bn_act(cols, w, bias, residual, relu):
    """cols: (M, K) bf16, w: (K, Cout) bf16 -> (M, Cout) bf16.

    Fused bias + optional residual add + optional ReLU epilogue. Contraction
    is a single grid step when Kp <= 1024, otherwise K is blocked at 512 on an
    'arbitrary' grid axis with f32 VMEM accumulation.
    """
    M, K = cols.shape
    Cout = w.shape[1]

    # --- tile selection ------------------------------------------------------
    Kp = _round_up(K, 128)
    if Kp <= 1024:
        TK = Kp                                   # single K step, no acc scratch
    else:
        TK = 512
        Kp = _round_up(Kp, TK)                    # zero-padding is matmul-safe
    Cp = _round_up(Cout, 128)                     # lane-dense output columns
    TM = min(512, _round_up(M, 16))               # bf16 packs 2 rows / sublane
    Mp = _round_up(M, TM)
    TN = 256 if Cp % 256 == 0 else 128            # 256-wide MXU on v6e/v7x

    # Guarantee >= 2 steps on a parallel grid axis when possible (v7x has two
    # TensorCores sharded over the parallel axes).
    if (Mp // TM) * (Cp // TN) < 2:
        if Cp // 128 >= 2:
            TN = 128
        elif TM >= 32:
            TM = _round_up(TM // 2, 16)
            Mp = _round_up(M, TM)

    # --- pad operands --------------------------------------------------------
    if (Mp, Kp) != (M, K):
        cols = jnp.pad(cols, ((0, Mp - M), (0, Kp - K)))
    if (Kp, Cp) != (K, Cout):
        w = jnp.pad(w, ((0, Kp - K), (0, Cp - Cout)))
    if Cp != Cout:
        bias = jnp.pad(bias, (0, Cp - Cout))
    bias = bias.reshape(1, Cp).astype(jnp.float32)

    nk = Kp // TK
    kblocked = nk > 1

    if kblocked:
        in_specs = [
            pl.BlockSpec((TM, TK), lambda i, j, k: (i, k)),
            pl.BlockSpec((TK, TN), lambda i, j, k: (k, j)),
            pl.BlockSpec((1, TN), lambda i, j, k: (0, j)),
        ]
        out_spec = pl.BlockSpec((TM, TN), lambda i, j, k: (i, j))
        res_spec = pl.BlockSpec((TM, TN), lambda i, j, k: (i, j))
        grid = (Mp // TM, Cp // TN, nk)
        sems = ("parallel", "parallel", "arbitrary")
        scratch = [pltpu.VMEM((TM, TN), jnp.float32)]
    else:
        in_specs = [
            pl.BlockSpec((TM, TK), lambda i, j: (i, 0)),
            pl.BlockSpec((TK, TN), lambda i, j: (0, j)),
            pl.BlockSpec((1, TN), lambda i, j: (0, j)),
        ]
        out_spec = pl.BlockSpec((TM, TN), lambda i, j: (i, j))
        res_spec = pl.BlockSpec((TM, TN), lambda i, j: (i, j))
        grid = (Mp // TM, Cp // TN)
        sems = ("parallel", "parallel")
        scratch = []

    args = [cols, w, bias]
    if residual is not None:
        res = residual
        if res.shape != (Mp, Cp):
            res = jnp.pad(res, ((0, Mp - M), (0, Cp - Cout)))
        in_specs.append(res_spec)
        args.append(res)
        kernel = functools.partial(
            _mm_res_kblk_kernel if kblocked else _mm_res_kernel, relu=relu)
    else:
        kernel = functools.partial(
            _mm_kblk_kernel if kblocked else _mm_kernel, relu=relu)

    out = pl.pallas_call(
        kernel,
        out_shape=jax.ShapeDtypeStruct((Mp, Cp), jnp.bfloat16),
        grid=grid,
        in_specs=in_specs,
        out_specs=out_spec,
        scratch_shapes=scratch,
        compiler_params=pltpu.CompilerParams(dimension_semantics=sems),
    )(*args)
    return out[:M, :Cout]


# ----------------------------------------------------------------------------
# Conv3d / MaxPool3d wrappers (glue + pallas_call)
# ----------------------------------------------------------------------------

def _im2col(x, ksize, stride, padding, dilation):
    N, T, H, W, C = x.shape
    kt, kh, kw = ksize
    st, sh, sw = stride
    pt, ph, pw = padding
    dt, dh, dw = dilation

    if (kt, kh, kw) == (1, 1, 1) and (pt, ph, pw) == (0, 0, 0):
        # 1x1x1 conv: pure strided slice + reshape, no patch stack.
        xs = x[:, ::st, ::sh, ::sw, :]
        N, To, Ho, Wo, C = xs.shape
        return xs.reshape(N * To * Ho * Wo, C), (N, To, Ho, Wo)

    xp = jnp.pad(x, ((0, 0), (pt, pt), (ph, ph), (pw, pw), (0, 0)))
    To = (T + 2 * pt - dt * (kt - 1) - 1) // st + 1
    Ho = (H + 2 * ph - dh * (kh - 1) - 1) // sh + 1
    Wo = (W + 2 * pw - dw * (kw - 1) - 1) // sw + 1
    patches = []
    for it in range(kt):
        for ih in range(kh):
            for iw in range(kw):
                patches.append(
                    xp[:, it * dt:it * dt + To * st:st,
                       ih * dh:ih * dh + Ho * sh:sh,
                       iw * dw:iw * dw + Wo * sw:sw, :])
    col = jnp.stack(patches, axis=-2)                 # (N,To,Ho,Wo,KK,C)
    col = col.reshape(N * To * Ho * Wo, kt * kh * kw * C)
    return col, (N, To, Ho, Wo)


@functools.partial(jax.jit,
                   static_argnames=("stride", "padding", "dilation", "relu"))
def conv3d_bn_act(x, p, residual=None, *, stride, padding, dilation=(1, 1, 1),
                  relu=True):
    """Conv3d + (folded) BN + optional residual add + optional ReLU."""
    w = p["w"]                                        # (kt,kh,kw,Cin,Cout) bf16
    ksize = w.shape[:3]
    cout = w.shape[4]
    if x.dtype != jnp.bfloat16:
        x = x.astype(jnp.bfloat16)
    cols, (N, To, Ho, Wo) = _im2col(x, ksize, stride, padding, dilation)
    res2 = None
    if residual is not None:
        if residual.dtype != jnp.bfloat16:
            residual = residual.astype(jnp.bfloat16)
        res2 = residual.reshape(-1, cout)
    out = _matmul_bn_act(cols, w.reshape(-1, cout), p["bias"], res2, relu)
    return out.reshape(N, To, Ho, Wo, cout)


@functools.partial(jax.jit, static_argnames=("ksize", "stride", "padding"))
def maxpool3d(x, *, ksize, stride, padding):
    # TODO(synk): pooling-window reduction done as a fused XLA jnp.maximum tree
    # (no kt*kh*kw window stack materialised in HBM); negligible compute.
    N, T, H, W, C = x.shape
    kt, kh, kw = ksize
    st, sh, sw = stride
    pt, ph, pw = padding
    xp = jnp.pad(x, ((0, 0), (pt, pt), (ph, ph), (pw, pw), (0, 0)),
                 constant_values=-jnp.inf)
    To = (T + 2 * pt - kt) // st + 1
    Ho = (H + 2 * ph - kh) // sh + 1
    Wo = (W + 2 * pw - kw) // sw + 1
    out = None
    for it in range(kt):
        for ih in range(kh):
            for iw in range(kw):
                win = xp[:, it:it + To * st:st,
                         ih:ih + Ho * sh:sh,
                         iw:iw + Wo * sw:sw, :]
                out = win if out is None else jnp.maximum(out, win)
    return out


# ----------------------------------------------------------------------------
# SlowFast (depth=50) parameter construction — deterministic synthetic init
# ----------------------------------------------------------------------------

EXPANSION = 4
STAGE_BLOCKS = (3, 4, 6, 3)          # ResNet-50
SPATIAL_STRIDES = (1, 2, 2, 2)
TEMPORAL_STRIDES = (1, 1, 1, 1)
DILATIONS = (1, 1, 1, 1)


class KeyGen:
    def __init__(self, seed):
        self._key = jax.random.PRNGKey(seed)
        self._n = 0

    def __call__(self):
        self._n += 1
        return jax.random.fold_in(self._key, self._n)


def make_conv_bn(kg, cin, cout, ksize, with_bn=True):
    kt, kh, kw = ksize
    fan_in = cin * kt * kh * kw
    w = jax.random.normal(kg(), (kt, kh, kw, cin, cout), jnp.float32)
    w = w * (2.0 / fan_in) ** 0.5
    if with_bn:
        eps = 1e-5
        gamma = jax.random.uniform(kg(), (cout,), jnp.float32, 0.8, 1.2)
        beta = jax.random.uniform(kg(), (cout,), jnp.float32, -0.1, 0.1)
        mean = jax.random.uniform(kg(), (cout,), jnp.float32, -0.1, 0.1)
        var = jax.random.uniform(kg(), (cout,), jnp.float32, 0.8, 1.2)
        scale = gamma / jnp.sqrt(var + eps)    # eval-mode BN folded to affine
        bias = beta - mean * scale
    else:
        scale = jnp.ones((cout,), jnp.float32)
        bias = jnp.zeros((cout,), jnp.float32)
    # Fold the BN scale into the weight columns; store weights as bf16 so no
    # per-call cast / copy is needed.
    w = (w * scale.reshape(1, 1, 1, 1, cout)).astype(jnp.bfloat16)
    return {"w": w, "bias": bias}


def build_pathway_params(kg, *, base_channels, conv1_kernel, inflate, lateral,
                         channel_ratio=8, fusion_kernel=5, in_channels=3):
    params = {"conv1_kernel": conv1_kernel, "lateral": lateral}
    params["conv1"] = make_conv_bn(kg, in_channels, base_channels, conv1_kernel)
    inplanes = base_channels
    if lateral:
        params["conv1_lateral"] = make_conv_bn(
            kg, inplanes // channel_ratio, inplanes * 2 // channel_ratio,
            (fusion_kernel, 1, 1), with_bn=False)
    layers, laterals = [], []
    for i, nblocks in enumerate(STAGE_BLOCKS):
        planes = base_channels * 2 ** i
        lateral_inplanes = inplanes * 2 // channel_ratio if lateral else 0
        blocks = []
        for b in range(nblocks):
            cin = inplanes + lateral_inplanes if b == 0 else planes * EXPANSION
            k1 = (3, 1, 1) if inflate[i] else (1, 1, 1)   # inflate_style='3x1x1'
            bp = {
                "conv1": make_conv_bn(kg, cin, planes, k1),
                "conv2": make_conv_bn(kg, planes, planes, (1, 3, 3)),
                "conv3": make_conv_bn(kg, planes, planes * EXPANSION, (1, 1, 1)),
            }
            if b == 0 and (SPATIAL_STRIDES[i] != 1 or cin != planes * EXPANSION):
                bp["downsample"] = make_conv_bn(kg, cin, planes * EXPANSION,
                                                (1, 1, 1))
            blocks.append(bp)
        layers.append({
            "blocks": blocks,
            "spatial_stride": SPATIAL_STRIDES[i],
            "temporal_stride": TEMPORAL_STRIDES[i],
            "dilation": DILATIONS[i],
            "inflate": inflate[i],
        })
        inplanes = planes * EXPANSION
        if lateral and i != len(STAGE_BLOCKS) - 1:
            laterals.append(make_conv_bn(
                kg, inplanes // channel_ratio, inplanes * 2 // channel_ratio,
                (fusion_kernel, 1, 1), with_bn=False))
    params["layers"] = layers
    params["laterals"] = laterals
    return params


# ----------------------------------------------------------------------------
# Forward pass (matches ResNet3dSlowFast.forward semantics)
# ----------------------------------------------------------------------------

def bottleneck3d(x, bp, spatial_stride, temporal_stride, dilation, inflate):
    p1 = (1, 0, 0) if inflate else (0, 0, 0)
    p2 = (0, dilation, dilation)
    out = conv3d_bn_act(x, bp["conv1"], stride=(1, 1, 1), padding=p1, relu=True)
    out = conv3d_bn_act(out, bp["conv2"],
                        stride=(temporal_stride, spatial_stride, spatial_stride),
                        padding=p2, dilation=(1, dilation, dilation), relu=True)
    if "downsample" in bp:
        identity = conv3d_bn_act(
            x, bp["downsample"],
            stride=(temporal_stride, spatial_stride, spatial_stride),
            padding=(0, 0, 0), relu=False)
    else:
        identity = x
    # conv3: bias + residual add + ReLU fused into the matmul epilogue.
    return conv3d_bn_act(out, bp["conv3"], identity, stride=(1, 1, 1),
                         padding=(0, 0, 0), relu=True)


def run_res_layer(x, lp):
    for b, bp in enumerate(lp["blocks"]):
        ss = lp["spatial_stride"] if b == 0 else 1
        ts = lp["temporal_stride"] if b == 0 else 1
        x = bottleneck3d(x, bp, ss, ts, lp["dilation"], lp["inflate"])
    return x


def pathway_stem(x, params, conv1_stride_t=1, pool1_stride_t=1):
    k = params["conv1_kernel"]
    pad = tuple((kk - 1) // 2 for kk in k)
    x = conv3d_bn_act(x, params["conv1"], stride=(conv1_stride_t, 2, 2),
                      padding=pad, relu=True)
    x = maxpool3d(x, ksize=(1, 3, 3), stride=(pool1_stride_t, 2, 2),
                  padding=(0, 1, 1))
    return x


def lateral_conv(x_fast, p, speed_ratio, fusion_kernel):
    # ConvModule with bias=False, no norm, no act (lateral_norm=False).
    return conv3d_bn_act(x_fast, p, stride=(speed_ratio, 1, 1),
                         padding=((fusion_kernel - 1) // 2, 0, 0), relu=False)


def slowfast_forward(x_ncthw, slow_params, fast_params,
                     resample_rate=8, speed_ratio=8, fusion_kernel=5):
    # NCTHW -> NTHWC
    x = jnp.transpose(x_ncthw, (0, 2, 3, 4, 1)).astype(jnp.float32)
    T = x.shape[1]

    # nearest temporal resample (scale_factor = 1/resample_rate)
    t_slow = int(T * (1.0 / resample_rate))
    x_slow = x[:, (jnp.arange(t_slow) * resample_rate)]
    x_slow = pathway_stem(x_slow, slow_params)

    fast_rate = resample_rate // speed_ratio            # == 1
    t_fast = int(T * (1.0 / fast_rate))
    x_fast = x[:, (jnp.arange(t_fast) * fast_rate)]
    x_fast = pathway_stem(x_fast, fast_params)

    if slow_params["lateral"]:
        xfl = lateral_conv(x_fast, slow_params["conv1_lateral"],
                           speed_ratio, fusion_kernel)
        x_slow = jnp.concatenate([x_slow, xfl], axis=-1)

    n_stages = len(STAGE_BLOCKS)
    for i in range(n_stages):
        x_slow = run_res_layer(x_slow, slow_params["layers"][i])
        x_fast = run_res_layer(x_fast, fast_params["layers"][i])
        if i != n_stages - 1 and slow_params["lateral"]:
            xfl = lateral_conv(x_fast, slow_params["laterals"][i],
                               speed_ratio, fusion_kernel)
            x_slow = jnp.concatenate([x_slow, xfl], axis=-1)

    # NTHWC -> NCTHW (PyTorch convention), back to f32
    return (jnp.transpose(x_slow, (0, 4, 1, 2, 3)).astype(jnp.float32),
            jnp.transpose(x_fast, (0, 4, 1, 2, 3)).astype(jnp.float32))


# ----------------------------------------------------------------------------
# Main
# ----------------------------------------------------------------------------

if __name__ == "__main__":
    key = jax.random.PRNGKey(0)
    # PyTorch-style input: (N, C, T, H, W) = (2, 3, 16, 32, 32)
    x = jax.random.normal(key, (2, 3, 16, 32, 32), jnp.float32)

    kg = KeyGen(0)
    # slow_pathway: lateral=True, base_channels=64, conv1_kernel=(1,7,7),
    #               inflate=(0,0,1,1)
    slow_params = build_pathway_params(
        kg, base_channels=64, conv1_kernel=(1, 7, 7),
        inflate=(0, 0, 1, 1), lateral=True)
    # fast_pathway: lateral=False, base_channels=8, conv1_kernel=(5,7,7)
    fast_params = build_pathway_params(
        kg, base_channels=8, conv1_kernel=(5, 7, 7),
        inflate=(1, 1, 1, 1), lateral=False)

    out_slow, out_fast = slowfast_forward(x, slow_params, fast_params)
    jax.block_until_ready((out_slow, out_fast))

    assert out_slow.shape == (2, 2048, 2, 1, 1), out_slow.shape
    assert out_fast.shape == (2, 256, 16, 1, 1), out_fast.shape
    print("KERNEL_OK")
</pallas_src>

<mosaic_0001>
module attributes {stable_mosaic.version = 11 : i64} {
  func.func @_mm_kernel(%arg0: i32, %arg1: i32, %arg2: memref<512x256xbf16, #tpu.memory_space<vmem>>, %arg3: memref<256x128xbf16, #tpu.memory_space<vmem>>, %arg4: memref<1x128xf32, #tpu.memory_space<vmem>>, %arg5: memref<512x128xbf16, #tpu.memory_space<vmem>>) attributes {dimension_semantics = [#tpu.dimension_semantics<parallel>, #tpu.dimension_semantics<parallel>], iteration_bounds = array<i64: 2, 1>, scalar_prefetch = 0 : i64, scratch_operands = 0 : i64, tpu.core_type = #tpu.core_type<tc>, window_params = [{transform_indices = @transform_0, window_bounds = array<i64: 512, 256>}, {transform_indices = @transform_1, window_bounds = array<i64: 256, 128>}, {transform_indices = @transform_2, window_bounds = array<i64: 1, 128>}, {transform_indices = @transform_3, window_bounds = array<i64: 512, 128>}]} {
    %c0 = arith.constant 0 : index
    %c0_0 = arith.constant 0 : index
    %0 = vector.load %arg2[%c0, %c0_0] : memref<512x256xbf16, #tpu.memory_space<vmem>>, vector<512x256xbf16>
    %c0_1 = arith.constant 0 : index
    %c0_2 = arith.constant 0 : index
    %1 = vector.load %arg3[%c0_1, %c0_2] : memref<256x128xbf16, #tpu.memory_space<vmem>>, vector<256x128xbf16>
    %cst = arith.constant dense<0.000000e+00> : vector<512x128xf32>
    %2 = tpu.matmul %0, %1, %cst {dimension_numbers = #tpu.dot_dimension_numbers<[1], [0], [0], [1], [0, 0, 1, 1], [], []>} : vector<512x256xbf16>, vector<256x128xbf16>, vector<512x128xf32> -> vector<512x128xf32>
    %c0_3 = arith.constant 0 : index
    %c0_4 = arith.constant 0 : index
    %3 = vector.load %arg4[%c0_3, %c0_4] : memref<1x128xf32, #tpu.memory_space<vmem>>, vector<1x128xf32>
    %4 = vector.broadcast %3 : vector<1x128xf32> to vector<512x128xf32>
    %5 = arith.addf %2, %4 : vector<512x128xf32>
    %cst_5 = arith.constant 0.000000e+00 : f32
    %6 = vector.broadcast %cst_5 : f32 to vector<512x128xf32>
    %7 = arith.maximumf %5, %6 : vector<512x128xf32>
    %8 = arith.truncf %7 : vector<512x128xf32> to vector<512x128xbf16>
    %c0_6 = arith.constant 0 : index
    %c0_7 = arith.constant 0 : index
    %9 = vector.load %arg5[%c0_6, %c0_7] : memref<512x128xbf16, #tpu.memory_space<vmem>>, vector<512x128xbf16>
    tpu.vector_store %arg5[%c0_6, %c0_7], %8 {strides = array<i32>} : memref<512x128xbf16, #tpu.memory_space<vmem>>, vector<512x128xbf16>,
    return
  }
  func.func @transform_0(%arg0: i32, %arg1: i32) -> (i32, i32) {
    %c0_i32 = arith.constant 0 : i32
    %c0_i32_0 = arith.constant 0 : i32
    return %arg0, %c0_i32 : i32, i32
  }
  func.func @transform_1(%arg0: i32, %arg1: i32) -> (i32, i32) {
    %c0_i32 = arith.constant 0 : i32
    %c0_i32_0 = arith.constant 0 : i32
    return %c0_i32, %arg1 : i32, i32
  }
  func.func @transform_2(%arg0: i32, %arg1: i32) -> (i32, i32) {
    %c0_i32 = arith.constant 0 : i32
    %c0_i32_0 = arith.constant 0 : i32
    return %c0_i32, %arg1 : i32, i32
  }
  func.func @transform_3(%arg0: i32, %arg1: i32) -> (i32, i32) {
    %c0_i32 = arith.constant 0 : i32
    return %arg0, %arg1 : i32, i32
  }
}

</mosaic_0001>

<bundles_post_ra>
// kernel: conv3d_bn_act.1
= control target key start
LH: loop header
LB: loop body
LE: loop exit
PB: predicated region body
PF: predicated region fallthrough
CT: control target
= control target key end

     0   :  { %8 = vsyncpa [#allocation3], 0  ;;  %s2616_s0 = inlined_call_operand.vmem [shape: bf16[1024,256], index: 0, kind: input, shape index: {}]   ;;  %s2617_s1 = inlined_call_operand.vmem [shape: bf16[256,128], index: 1, kind: input, shape index: {}]   ;;  %s2618_s2 = inlined_call_operand.vmem [shape: f32[1,128], index: 2, kind: input, shape index: {}]   ;;  %s2619_s3 = inlined_call_operand.hbm [shape: bf16[1024,128], index: 3, kind: output, shape index: {}]  }
   0x1   :  { %10 = vsyncpa [#allocation3 + $0x1], 0  ;;  %s2249_s12 = smov 0   ;;  %s2251_s13 = smov 0  }
   0x2   :  { %s2253_s14 = smov 0   ;;  %s2255_s15 = smov 0  }
   0x3   :  { %s2257_s16 = smov 0   ;;  %s2259_s17 = smov 0  }
   0x4 LB: > { %s1527_s18 = sadd.s32 4294967295, %s2223_s17   ;;  %s1528_s19 = sadd.s32 4294967294, %s2223_s17   ;;  %s2223_s17 = sphi %s2259_s17, %s16_s17   ;;  %s2219_s16 = sphi %s2257_s16, %s2626_s16   ;;  %s2215_s15 = sphi %s2255_s15, %s2625_s15   ;;  %s2211_s14 = sphi %s2253_s14, %s2624_s14   ;;  %s2207_s13 = sphi %s2251_s13, %s2623_s13   ;;  %s2203_s12 = sphi %s2249_s12, %s2622_s12  }
   0x5   : > { %s28_s20 = sadd.s32 1, %s2219_s16  ;;  %s115_s21 = sadd.s32 1, %s2211_s14 }
   0x6   : > { %p30_p0 = scmp.ge.s32.totalorder %s28_s20, 2  ;;  %p125_p1 = scmp.ne.s32.totalorder %s2211_s14, %s2207_s13 }
   0x7   : > { %p126_p2 = scmp.eq.s32.totalorder %s1527_s18, 1  ;;  %p131_p3 = scmp.ne.s32.totalorder %s2207_s13, %s2203_s12 }
   0x8   : > { %s2628_s20 = smov (%p30_p0, %s28_s20), 0  ;;  %p132_p5 = scmp.eq.s32.totalorder %s1528_s19, 1 }
   0x9   : > { %p2289_p4 = por %p126_p2, %p125_p1  ;;  %s110_s23 = ssub.s32 %s2219_s16, %s2628_s20 }
   0xa   : > { %p1533_p6 = scmp.ge.s32.totalorder %s2223_s17, 1  ;;  %p113_p7 = scmp.eq.s32.totalorder %s110_s23, 0 }
   0xb   : > { %p2296_p8 = por %p132_p5, %p131_p3  ;;  %p173_p9 = scmp.lt.s32.totalorder %s2223_s17, 3 }
   0xc   : > { %s2302_s25 = scalar_select %p113_p7, %s2211_s14, %s115_s21  }
   0xd   : > { %p174_p10 = pnand %p1533_p6, %p173_p9 }
   0xe   : > { %s1535_s28 = sshll.u32 (!%p174_p10), %s2215_s15, 6  ;;  %s202_s5 = sand.u32 (!%p174_p10), 1, %s2207_s13  }
   0xf   : > { %177 = sbr.rel (%p174_p10) target bundleno = 422 (0x1a6), region = 32  ;;  %p206_p11 = scmp.lt.s32.totalorder (!%p174_p10), %s1535_s28, 127 }
  0x10   : > { %s1753_s7 = sshll.u32 (!%p174_p10), %s2215_s15, 12  ;;  %s2571_s15 = scalar_lea.sflag (!%p174_p10), [#allocation3], %s202_s5 }
  0x11   : > { %s2563_s11 = scalar_lea.hbm (!%p174_p10), %s2619_s3, %s1753_s7  ;;  %s2226_s21 = smov (!%p174_p10), [#allocation2]  }
  0x12   : > { %s2151_s23 = sshll.u32 (!%p174_p10), %s2226_s21, 4  ;;  %s2152_s23 = int_to_ptr.vmem [resolvable:$false] %s2151_s23 }
  0x13   : > { %s2153_s26 = scalar_lea.vmem (!%p174_p10), %s2152_s23, 8192 }
  0x14   : > { %v2035_v0 = vld [vmem:[%s2617_s1 + $0x38] sm:$0xff]   ;;  %v2225_v1 = vmov 0   ;;  %v2036_v2 = vld [vmem:[%s2617_s1 + $0x30] sm:$0xff]   ;;  %v2037_v3 = vld [vmem:[%s2617_s1 + $0x28] sm:$0xff]   ;;  %s2630_s28 = smov (!%p206_p11, %s1535_s28), 127 }
  0x15   : > { %740 = vmatprep.subr.bf16.mxu0 %v2225_v1  ;;  %1945 = vmatprep.subr.bf16.mxu1 %v2225_v1  ;;  %v2038_v4 = vld [vmem:[%s2617_s1 + $0x20] sm:$0xff]   ;;  %s1688_s8 = sshll.u32 %s2630_s28, 3  ;;  %v2039_v5 = vld [vmem:[%s2617_s1 + $0x18] sm:$0xff]   ;;  %v2040_v7 = vld [vmem:[%s2617_s1 + $0x10] sm:$0xff]  }
  0x16   : > { %741 = vmatpush1.bf16.msra.mxu0 %v2035_v0  ;;  %1961 = vmatpush1.bf16.msra.mxu1 %v2035_v0  ;;  %s2331_s19 = scalar_lea.vmem %s2616_s0, %s1688_s8  ;;  %v2041_v9 = vld [vmem:[%s2617_s1 + $0x8] sm:$0xff]   ;;  %v2042_v10 = vld [vmem:[%s2617_s1] sm:$0xff]   ;;  %v2043_v11 = vld [vmem:[%s2617_s1 + $0x78] sm:$0xff]  }
  0x17   : > { %742 = vmatprep.subr.bf16.mxu0 %v2225_v1  ;;  %1946 = vmatprep.subr.bf16.mxu1 %v2225_v1  ;;  %v2053_v6 = vld [vmem:[%s2331_s19 + $0x4] ss:$8 sps:$4 sm:$0xff]   ;;  %v2044_v12 = vld [vmem:[%s2617_s1 + $0x70] sm:$0xff]   ;;  %v2047_v15 = vld [vmem:[%s2617_s1 + $0x58] sm:$0xff]  }
  0x18   : > { %v2056_v8 = vld [vmem:[%s2331_s19 + $0x104] ss:$8 sps:$4 sm:$0xff]   ;;  %772 = vmatprep.mubr.bf16.mxu0 %v2053_v6  ;;  %v2048_v16 = vld [vmem:[%s2617_s1 + $0x50] sm:$0xff]   ;;  %v2051_v19 = vld [vmem:[%s2331_s19] ss:$8 sps:$4 sm:$0xff]  }
  0x19   : > { %900 = vmatprep.mubr.bf16.mxu1 %v2056_v8  ;;  %v2045_v13 = vld [vmem:[%s2617_s1 + $0x68] sm:$0xff]   ;;  %v2046_v14 = vld [vmem:[%s2617_s1 + $0x60] sm:$0xff]   ;;  %v2057_v21 = vld [vmem:[%s2331_s19 + $0x14] ss:$8 sps:$4 sm:$0xff]  }
  0x1a   : > { %743 = vmatpush1.bf16.msra.mxu0 %v2036_v2  ;;  %1962 = vmatpush1.bf16.msra.mxu1 %v2036_v2  ;;  %v2049_v17 = vld [vmem:[%s2617_s1 + $0x48] sm:$0xff]   ;;  %v2050_v18 = vld [vmem:[%s2617_s1 + $0x40] sm:$0xff]   ;;  %v2059_v22 = vld [vmem:[%s2331_s19 + $0x114] ss:$8 sps:$4 sm:$0xff]  }
  0x1b   : > { %744 = vmatprep.subr.bf16.mxu0 %v2225_v1  ;;  %1947 = vmatprep.subr.bf16.mxu1 %v2225_v1  ;;  %v2054_v20 = vld [vmem:[%s2331_s19 + $0x100] ss:$8 sps:$4 sm:$0xff]   ;;  %v2061_v23 = vld [vmem:[%s2331_s19 + $0x10] ss:$8 sps:$4 sm:$0xff]   ;;  %v2063_v25 = vld [vmem:[%s2331_s19 + $0x24] ss:$8 sps:$4 sm:$0xff]  }
  0x1c   : > { %v2062_v24 = vld [vmem:[%s2331_s19 + $0x110] ss:$8 sps:$4 sm:$0xff]   ;;  %v2065_v26 = vld [vmem:[%s2331_s19 + $0x124] ss:$8 sps:$4 sm:$0xff]   ;;  %v2067_v27 = vld [vmem:[%s2331_s19 + $0x20] ss:$8 sps:$4 sm:$0xff]  }
  0x1d   : > { %v2068_v28 = vld [vmem:[%s2331_s19 + $0x120] ss:$8 sps:$4 sm:$0xff]   ;;  %v2069_v29 = vld [vmem:[%s2331_s19 + $0x34] ss:$8 sps:$4 sm:$0xff]   ;;  %v2073_v31 = vld [vmem:[%s2331_s19 + $0x30] ss:$8 sps:$4 sm:$0xff]  }
  0x1e   : > { %745 = vmatpush1.bf16.msra.mxu0 %v2037_v3  ;;  %1963 = vmatpush1.bf16.msra.mxu1 %v2037_v3  ;;  %v2071_v30 = vld [vmem:[%s2331_s19 + $0x134] ss:$8 sps:$4 sm:$0xff]   ;;  %v2074_v32 = vld [vmem:[%s2331_s19 + $0x130] ss:$8 sps:$4 sm:$0xff]   ;;  %v2075_v33 = vld [vmem:[%s2331_s19 + $0x44] ss:$8 sps:$4 sm:$0xff]  }
  0x1f   : > { %746 = vmatprep.subr.bf16.mxu0 %v2225_v1  ;;  %1948 = vmatprep.subr.bf16.mxu1 %v2225_v1  ;;  %v2077_v34 = vld [vmem:[%s2331_s19 + $0x144] ss:$8 sps:$4 sm:$0xff]   ;;  %v2079_v35 = vld [vmem:[%s2331_s19 + $0x40] ss:$8 sps:$4 sm:$0xff]   ;;  %v2081_v37 = vld [vmem:[%s2331_s19 + $0x54] ss:$8 sps:$4 sm:$0xff]  }
  0x20   : > { %v2080_v36 = vld [vmem:[%s2331_s19 + $0x140] ss:$8 sps:$4 sm:$0xff]   ;;  %v2083_v38 = vld [vmem:[%s2331_s19 + $0x154] ss:$8 sps:$4 sm:$0xff]   ;;  %v2085_v39 = vld [vmem:[%s2331_s19 + $0x50] ss:$8 sps:$4 sm:$0xff]  }
  0x21   : > { %v2086_v40 = vld [vmem:[%s2331_s19 + $0x150] ss:$8 sps:$4 sm:$0xff]   ;;  %v2087_v41 = vld [vmem:[%s2331_s19 + $0x64] ss:$8 sps:$4 sm:$0xff]   ;;  %v2091_v43 = vld [vmem:[%s2331_s19 + $0x60] ss:$8 sps:$4 sm:$0xff]  }
  0x22   : > { %747 = vmatpush1.bf16.msra.mxu0 %v2038_v4  ;;  %1964 = vmatpush1.bf16.msra.mxu1 %v2038_v4  ;;  %v2089_v42 = vld [vmem:[%s2331_s19 + $0x164] ss:$8 sps:$4 sm:$0xff]   ;;  %v2092_v44 = vld [vmem:[%s2331_s19 + $0x160] ss:$8 sps:$4 sm:$0xff]   ;;  %v2093_v45 = vld [vmem:[%s2331_s19 + $0x74] ss:$8 sps:$4 sm:$0xff]  }
  0x23   : > { %748 = vmatprep.subr.bf16.mxu0 %v2225_v1  ;;  %1949 = vmatprep.subr.bf16.mxu1 %v2225_v1  ;;  %v2095_v46 = vld [vmem:[%s2331_s19 + $0x174] ss:$8 sps:$4 sm:$0xff]   ;;  %v2097_v47 = vld [vmem:[%s2331_s19 + $0x70] ss:$8 sps:$4 sm:$0xff]   ;;  %v2099_v49 = vld [vmem:[%s2331_s19 + $0x84] ss:$8 sps:$4 sm:$0xff]  }
  0x24   : > { %v2098_v48 = vld [vmem:[%s2331_s19 + $0x170] ss:$8 sps:$4 sm:$0xff]   ;;  %v2101_v50 = vld [vmem:[%s2331_s19 + $0x184] ss:$8 sps:$4 sm:$0xff]   ;;  %v2103_v51 = vld [vmem:[%s2331_s19 + $0x80] ss:$8 sps:$4 sm:$0xff]  }
  0x25   : > { %v2104_v52 = vld [vmem:[%s2331_s19 + $0x180] ss:$8 sps:$4 sm:$0xff]   ;;  %v2105_v53 = vld [vmem:[%s2331_s19 + $0x94] ss:$8 sps:$4 sm:$0xff]   ;;  %v2109_v55 = vld [vmem:[%s2331_s19 + $0x90] ss:$8 sps:$4 sm:$0xff]  }
  0x26   : > { %749 = vmatpush1.bf16.msra.mxu0 %v2039_v5  ;;  %1965 = vmatpush1.bf16.msra.mxu1 %v2039_v5  ;;  %v2107_v54 = vld [vmem:[%s2331_s19 + $0x194] ss:$8 sps:$4 sm:$0xff]   ;;  %v2110_v56 = vld [vmem:[%s2331_s19 + $0x190] ss:$8 sps:$4 sm:$0xff]   ;;  %v2111_v57 = vld [vmem:[%s2331_s19 + $0xa4] ss:$8 sps:$4 sm:$0xff]  }
  0x27   : > { %750 = vmatprep.subr.bf16.mxu0 %v2225_v1  ;;  %1950 = vmatprep.subr.bf16.mxu1 %v2225_v1  ;;  %v2113_v58 = vld [vmem:[%s2331_s19 + $0x1a4] ss:$8 sps:$4 sm:$0xff]   ;;  %v2115_v59 = vld [vmem:[%s2331_s19 + $0xa0] ss:$8 sps:$4 sm:$0xff]   ;;  %v2117_v61 = vld [vmem:[%s2331_s19 + $0xb4] ss:$8 sps:$4 sm:$0xff]  }
  0x28   : > { %v2116_v60 = vld [vmem:[%s2331_s19 + $0x1a0] ss:$8 sps:$4 sm:$0xff]   ;;  %v2119_v62 = vld [vmem:[%s2331_s19 + $0x1b4] ss:$8 sps:$4 sm:$0xff]   ;;  %v2121_v63 = vld [vmem:[%s2331_s19 + $0xb0] ss:$8 sps:$4 sm:$0xff]  }
  0x29   : > { %v2122_v0 = vld [vmem:[%s2331_s19 + $0x1b0] ss:$8 sps:$4 sm:$0xff]   ;;  %v2125_v2 = vld [vmem:[%s2331_s19 + $0x1c4] ss:$8 sps:$4 sm:$0xff]   ;;  %v2127_v3 = vld [vmem:[%s2331_s19 + $0xc0] ss:$8 sps:$4 sm:$0xff]  }
  0x2a   : > { %751 = vmatpush1.bf16.msra.mxu0 %v2040_v7  ;;  %1966 = vmatpush1.bf16.msra.mxu1 %v2040_v7  ;;  %v2128_v4 = vld [vmem:[%s2331_s19 + $0x1c0] ss:$8 sps:$4 sm:$0xff]   ;;  %v2129_v5 = vld [vmem:[%s2331_s19 + $0xd4] ss:$8 sps:$4 sm:$0xff]   ;;  %v2133_v7 = vld [vmem:[%s2331_s19 + $0xd0] ss:$8 sps:$4 sm:$0xff]  }
  0x2b   : > { %752 = vmatprep.subr.bf16.mxu0 %v2225_v1  ;;  %1951 = vmatprep.subr.bf16.mxu1 %v2225_v1  ;;  %v2131_v6 = vld [vmem:[%s2331_s19 + $0x1d4] ss:$8 sps:$4 sm:$0xff]   ;;  %v2134_v8 = vld [vmem:[%s2331_s19 + $0x1d0] ss:$8 sps:$4 sm:$0xff]  }
  0x2e   : > { %753 = vmatpush1.bf16.msra.mxu0 %v2041_v9  ;;  %1967 = vmatpush1.bf16.msra.mxu1 %v2041_v9  ;;  %v2135_v9 = vld [vmem:[%s2331_s19 + $0xe4] ss:$8 sps:$4 sm:$0xff]  }
  0x2f   : > { %754 = vmatprep.subr.bf16.mxu0 %v2225_v1  ;;  %1952 = vmatprep.subr.bf16.mxu1 %v2225_v1 }
  0x32   : > { %755 = vmatpush1.bf16.msra.mxu0 %v2042_v10  ;;  %1968 = vmatpush1.bf16.msra.mxu1 %v2042_v10  ;;  %v2137_v10 = vld [vmem:[%s2331_s19 + $0x1e4] ss:$8 sps:$4 sm:$0xff]  }
  0x33   : > { %756 = vmatprep.subr.bf16.mxu0 %v2225_v1  ;;  %1953 = vmatprep.subr.bf16.mxu1 %v2225_v1 }
  0x36   : > { %757 = vmatpush2.bf16.msra.mxu0 %v2043_v11  ;;  %1969 = vmatpush2.bf16.msra.mxu1 %v2043_v11  ;;  %v2139_v11 = vld [vmem:[%s2331_s19 + $0xe0] ss:$8 sps:$4 sm:$0xff]  }
  0x37   : > { %758 = vmatprep.subr.bf16.mxu0 %v2225_v1  ;;  %1954 = vmatprep.subr.bf16.mxu1 %v2225_v1 }
  0x3a   : > { %759 = vmatpush2.bf16.msra.mxu0 %v2044_v12  ;;  %1970 = vmatpush2.bf16.msra.mxu1 %v2044_v12  ;;  %v2140_v12 = vld [vmem:[%s2331_s19 + $0x1e0] ss:$8 sps:$4 sm:$0xff]  }
  0x3b   : > { %760 = vmatprep.subr.bf16.mxu0 %v2225_v1  ;;  %1955 = vmatprep.subr.bf16.mxu1 %v2225_v1 }
  0x3e   : > { %761 = vmatpush2.bf16.msra.mxu0 %v2045_v13  ;;  %1971 = vmatpush2.bf16.msra.mxu1 %v2045_v13  ;;  %v2141_v13 = vld [vmem:[%s2331_s19 + $0xf4] ss:$8 sps:$4 sm:$0xff]  }
  0x3f   : > { %762 = vmatprep.subr.bf16.mxu0 %v2225_v1  ;;  %1956 = vmatprep.subr.bf16.mxu1 %v2225_v1 }
  0x42   : > { %763 = vmatpush2.bf16.msra.mxu0 %v2046_v14  ;;  %1972 = vmatpush2.bf16.msra.mxu1 %v2046_v14  ;;  %v2143_v14 = vld [vmem:[%s2331_s19 + $0x1f4] ss:$8 sps:$4 sm:$0xff]  }
  0x43   : > { %764 = vmatprep.subr.bf16.mxu0 %v2225_v1  ;;  %1957 = vmatprep.subr.bf16.mxu1 %v2225_v1 }
  0x46   : > { %765 = vmatpush2.bf16.msra.mxu0 %v2047_v15  ;;  %1973 = vmatpush2.bf16.msra.mxu1 %v2047_v15  ;;  %v2145_v15 = vld [vmem:[%s2331_s19 + $0xf0] ss:$8 sps:$4 sm:$0xff]  }
  0x47   : > { %766 = vmatprep.subr.bf16.mxu0 %v2225_v1  ;;  %1958 = vmatprep.subr.bf16.mxu1 %v2225_v1 }
  0x4a   : > { %767 = vmatpush2.bf16.msra.mxu0 %v2048_v16  ;;  %1974 = vmatpush2.bf16.msra.mxu1 %v2048_v16  ;;  %v2146_v16 = vld [vmem:[%s2331_s19 + $0x1f0] ss:$8 sps:$4 sm:$0xff]  }
  0x4b   : > { %768 = vmatprep.subr.bf16.mxu0 %v2225_v1  ;;  %1959 = vmatprep.subr.bf16.mxu1 %v2225_v1 }
  0x4e   : > { %769 = vmatpush2.bf16.msra.mxu0 %v2049_v17  ;;  %1975 = vmatpush2.bf16.msra.mxu1 %v2049_v17  ;;  %v2457_v17 = vld [vmem:[%s2618_s2] ss:$0 sm:$0xff] }
  0x4f   : > { %770 = vmatprep.subr.bf16.mxu0 %v2225_v1  ;;  %1960 = vmatprep.subr.bf16.mxu1 %v2225_v1  ;;  %v2123_v1 = vld [vmem:[%s2331_s19 + $0xc4] ss:$8 sps:$4 sm:$0xff]   ;;  %s1534_s19 = sshll.u32 %s202_s5, 8 }
  0x50   : > { %s2466_s6 = scalar_lea.vmem [#allocation2], %s1534_s19 }
  0x51   : > { %s1428_s8 = sshll.u32 %s2466_s6, 4  ;;  %s2565_s8 = int_to_ptr.vmem [resolvable:$true] %s1428_s8 }
  0x52   : > { %771 = vmatpush2.bf16.msra.mxu0 %v2050_v18  ;;  %1976 = vmatpush2.bf16.msra.mxu1 %v2050_v18  ;;  %s2147_s18 = scalar_lea.vmem %s2565_s8, 4096  ;;  %p2154_p1 = scmp.lt.s32.totalorder %s2565_s8, %s2152_s23 }
  0x53   : > { %p2148_p12 = scmp.ne.s32.totalorder %s2565_s8, %s2147_s18  ;;  %p2155_p2 = scmp.lt.s32.totalorder %s2153_s26, %s2147_s18 }
  0x55   : > { %773 = vmatmul.mubr.bf16.vlgmr.msra.gmra.mxu0 %v2051_v19  ;;  %901 = vmatmul.mubr.bf16.vlgmr.msra.gmra.mxu1 %v2054_v20  ;;  %p2149_p13 = pnand %p2148_p12, %p2289_p4  ;;  %p2156_p3 = por %p2155_p2, %p2154_p1 }
  0x56   : > { %780 = vmatprep.mubr.bf16.mxu0 %v2057_v21  ;;  %908 = vmatprep.mubr.bf16.mxu1 %v2059_v22 }
  0x57   : > { %p2150_p0 = pneg %p2149_p13 }
  0x59   : > { %p2157_p5 = pnand %p2156_p3, %p2150_p0 }
  0x5d   : > { %781 = vmatmul.mubr.bf16.gmra.mxu0 %v2061_v23  ;;  %909 = vmatmul.mubr.bf16.gmra.mxu1 %v2062_v24 }
  0x5e   : > { %788 = vmatprep.mubr.bf16.mxu0 %v2063_v25  ;;  %916 = vmatprep.mubr.bf16.mxu1 %v2065_v26 }
  0x65   : > { %789 = vmatmul.mubr.bf16.gmra.mxu0 %v2067_v27  ;;  %917 = vmatmul.mubr.bf16.gmra.mxu1 %v2068_v28 }
  0x66   : > { %796 = vmatprep.mubr.bf16.mxu0 %v2069_v29  ;;  %924 = vmatprep.mubr.bf16.mxu1 %v2071_v30 }
  0x6d   : > { %797 = vmatmul.mubr.bf16.gmra.mxu0 %v2073_v31  ;;  %925 = vmatmul.mubr.bf16.gmra.mxu1 %v2074_v32 }
  0x6e   : > { %804 = vmatprep.mubr.bf16.mxu0 %v2075_v33  ;;  %932 = vmatprep.mubr.bf16.mxu1 %v2077_v34 }
  0x75   : > { %805 = vmatmul.mubr.bf16.gmra.mxu0 %v2079_v35  ;;  %933 = vmatmul.mubr.bf16.gmra.mxu1 %v2080_v36 }
  0x76   : > { %812 = vmatprep.mubr.bf16.mxu0 %v2081_v37  ;;  %940 = vmatprep.mubr.bf16.mxu1 %v2083_v38 }
  0x7d   : > { %813 = vmatmul.mubr.bf16.gmra.mxu0 %v2085_v39  ;;  %941 = vmatmul.mubr.bf16.gmra.mxu1 %v2086_v40 }
  0x7e   : > { %820 = vmatprep.mubr.bf16.mxu0 %v2087_v41  ;;  %948 = vmatprep.mubr.bf16.mxu1 %v2089_v42 }
  0x85   : > { %821 = vmatmul.mubr.bf16.gmra.mxu0 %v2091_v43  ;;  %949 = vmatmul.mubr.bf16.gmra.mxu1 %v2092_v44 }
  0x86   : > { %828 = vmatprep.mubr.bf16.mxu0 %v2093_v45  ;;  %956 = vmatprep.mubr.bf16.mxu1 %v2095_v46 }
  0x8d   : > { %829 = vmatmul.mubr.bf16.gmra.mxu0 %v2097_v47  ;;  %957 = vmatmul.mubr.bf16.gmra.mxu1 %v2098_v48 }
  0x8e   : > { %836 = vmatprep.mubr.bf16.mxu0 %v2099_v49  ;;  %964 = vmatprep.mubr.bf16.mxu1 %v2101_v50 }
  0x95   : > { %837 = vmatmul.mubr.bf16.gmra.mxu0 %v2103_v51  ;;  %965 = vmatmul.mubr.bf16.gmra.mxu1 %v2104_v52 }
  0x96   : > { %844 = vmatprep.mubr.bf16.mxu0 %v2105_v53  ;;  %972 = vmatprep.mubr.bf16.mxu1 %v2107_v54 }
  0x9d   : > { %845 = vmatmul.mubr.bf16.gmra.mxu0 %v2109_v55  ;;  %973 = vmatmul.mubr.bf16.gmra.mxu1 %v2110_v56 }
  0x9e   : > { %852 = vmatprep.mubr.bf16.mxu0 %v2111_v57  ;;  %980 = vmatprep.mubr.bf16.mxu1 %v2113_v58 }
  0xa5   : > { %853 = vmatmul.mubr.bf16.gmra.mxu0 %v2115_v59  ;;  %981 = vmatmul.mubr.bf16.gmra.mxu1 %v2116_v60 }
  0xa6   : > { %860 = vmatprep.mubr.bf16.mxu0 %v2117_v61  ;;  %988 = vmatprep.mubr.bf16.mxu1 %v2119_v62 }
  0xad   : > { %861 = vmatmul.mubr.bf16.gmra.mxu0 %v2121_v63  ;;  %989 = vmatmul.mubr.bf16.gmra.mxu1 %v2122_v0 }
  0xae   : > { %868 = vmatprep.mubr.bf16.mxu0 %v2123_v1  ;;  %996 = vmatprep.mubr.bf16.mxu1 %v2125_v2 }
  0xb5   : > { %869 = vmatmul.mubr.bf16.gmra.mxu0 %v2127_v3  ;;  %997 = vmatmul.mubr.bf16.gmra.mxu1 %v2128_v4 }
  0xb6   : > { %876 = vmatprep.mubr.bf16.mxu0 %v2129_v5  ;;  %1004 = vmatprep.mubr.bf16.mxu1 %v2131_v6 }
  0xbd   : > { %877 = vmatmul.mubr.bf16.gmra.mxu0 %v2133_v7  ;;  %1005 = vmatmul.mubr.bf16.gmra.mxu1 %v2134_v8 }
  0xbe   : > { %884 = vmatprep.mubr.bf16.mxu0 %v2135_v9  ;;  %1012 = vmatprep.mubr.bf16.mxu1 %v2137_v10 }
  0xc5   : > { %885 = vmatmul.mubr.bf16.gmra.mxu0 %v2139_v11  ;;  %1013 = vmatmul.mubr.bf16.gmra.mxu1 %v2140_v12 }
  0xc6   : > { %892 = vmatprep.mubr.bf16.mxu0 %v2141_v13  ;;  %1020 = vmatprep.mubr.bf16.mxu1 %v2143_v14 }
  0xcd   : > { %893 = vmatmul.mubr.bf16.gmra.mxu0 %v2145_v15  ;;  %1021 = vmatmul.mubr.bf16.gmra.mxu1 %v2146_v16 }
 0x115   : > { %v774_v18 = vpop.f32.mrf.mxu0  ;;  %v902_v19 = vpop.f32.mrf.mxu1 }
 0x116   : > { %v775_v22 = vadd.f32 %v2457_v17, %v774_v18  ;;  %v903_v23 = vadd.f32 %v2457_v17, %v902_v19 }
 0x117   : > { %v776_v20 = vpop.f32.mrf.mxu0  ;;  %v904_v21 = vpop.f32.mrf.mxu1 }
 0x118   : > { %v1029_v30 = vmax.f32 %v775_v22, 0.0  ;;  %v1061_v31 = vmax.f32 %v903_v23, 0.0 }
 0x119   : > { %v777_v24 = vpop.f32.mrf.mxu0  ;;  %v905_v25 = vpop.f32.mrf.mxu1 }
 0x11a   : > { %v778_v26 = vadd.f32 %v2457_v17, %v777_v24  ;;  %v906_v27 = vadd.f32 %v2457_v17, %v905_v25 }
 0x11b   : > { %v779_v28 = vpop.f32.mrf.mxu0  ;;  %v907_v29 = vpop.f32.mrf.mxu1 }
 0x11c   : > { %v1030_v32 = vmax.f32 %v778_v26, 0.0  ;;  %v1062_v33 = vmax.f32 %v906_v27, 0.0 }
 0x11d   : > { %v782_v34 = vpop.f32.mrf.mxu0  ;;  %v910_v35 = vpop.f32.mrf.mxu1 }
 0x11e   : > { %v1757_v36 = vpack.c.bf16 %v1030_v32, %v1029_v30  ;;  %v1837_v37 = vpack.c.bf16 %v1062_v33, %v1061_v31  ;;  %v783_v40 = vadd.f32 %v2457_v17, %v782_v34  ;;  %v911_v41 = vadd.f32 %v2457_v17, %v910_v35 }
 0x11f   : > { %v784_v38 = vpop.f32.mrf.mxu0  ;;  %v912_v39 = vpop.f32.mrf.mxu1 }
 0x120   : > { %1758 = vst [vmem:[%s2466_s6] sm:$0xff] %v1757_v36   ;;  %1929 = vst [vmem:[%s2466_s6 + $0x80] sm:$0xff] %v1837_v37   ;;  %v1031_v48 = vmax.f32 %v783_v40, 0.0  ;;  %v1063_v49 = vmax.f32 %v911_v41, 0.0 }
 0x121   : > { %v785_v42 = vpop.f32.mrf.mxu0  ;;  %v913_v43 = vpop.f32.mrf.mxu1 }
 0x122   : > { %v786_v44 = vadd.f32 %v2457_v17, %v785_v42  ;;  %v914_v45 = vadd.f32 %v2457_v17, %v913_v43 }
 0x123   : > { %v787_v46 = vpop.f32.mrf.mxu0  ;;  %v915_v47 = vpop.f32.mrf.mxu1 }
 0x124   : > { %v1032_v50 = vmax.f32 %v786_v44, 0.0  ;;  %v1064_v51 = vmax.f32 %v914_v45, 0.0 }
 0x125   : > { %v790_v52 = vpop.f32.mrf.mxu0  ;;  %v918_v53 = vpop.f32.mrf.mxu1 }
 0x126   : > { %v1762_v54 = vpack.c.bf16 %v1032_v50, %v1031_v48  ;;  %v1842_v55 = vpack.c.bf16 %v1064_v51, %v1063_v49  ;;  %v791_v58 = vadd.f32 %v2457_v17, %v790_v52  ;;  %v919_v59 = vadd.f32 %v2457_v17, %v918_v53 }
 0x127   : > { %v792_v56 = vpop.f32.mrf.mxu0  ;;  %v920_v57 = vpop.f32.mrf.mxu1 }
 0x128   : > { %1914 = vst [vmem:[%s2466_s6 + $0x8] sm:$0xff] %v1762_v54   ;;  %1930 = vst [vmem:[%s2466_s6 + $0x88] sm:$0xff] %v1842_v55   ;;  %v1033_v2 = vmax.f32 %v791_v58, 0.0  ;;  %v1065_v3 = vmax.f32 %v919_v59, 0.0 }
 0x129   : > { %v793_v60 = vpop.f32.mrf.mxu0  ;;  %v921_v61 = vpop.f32.mrf.mxu1 }
 0x12a   : > { %v794_v62 = vadd.f32 %v2457_v17, %v793_v60  ;;  %v922_v63 = vadd.f32 %v2457_v17, %v921_v61 }
 0x12b   : > { %v795_v0 = vpop.f32.mrf.mxu0  ;;  %v923_v1 = vpop.f32.mrf.mxu1 }
 0x12c   : > { %v1034_v4 = vmax.f32 %v794_v62, 0.0  ;;  %v1066_v5 = vmax.f32 %v922_v63, 0.0 }
 0x12d   : > { %v798_v6 = vpop.f32.mrf.mxu0  ;;  %v926_v7 = vpop.f32.mrf.mxu1 }
 0x12e   : > { %v1767_v8 = vpack.c.bf16 %v1034_v4, %v1033_v2  ;;  %v1847_v9 = vpack.c.bf16 %v1066_v5, %v1065_v3  ;;  %v799_v12 = vadd.f32 %v2457_v17, %v798_v6  ;;  %v927_v13 = vadd.f32 %v2457_v17, %v926_v7 }
 0x12f   : > { %v800_v10 = vpop.f32.mrf.mxu0  ;;  %v928_v11 = vpop.f32.mrf.mxu1 }
 0x130   : > { %1915 = vst [vmem:[%s2466_s6 + $0x10] sm:$0xff] %v1767_v8   ;;  %1931 = vst [vmem:[%s2466_s6 + $0x90] sm:$0xff] %v1847_v9   ;;  %v1035_v21 = vmax.f32 %v799_v12, 0.0  ;;  %v1067_v22 = vmax.f32 %v927_v13, 0.0 }
 0x131   : > { %v801_v14 = vpop.f32.mrf.mxu0  ;;  %v929_v15 = vpop.f32.mrf.mxu1 }
 0x132   : > { %v802_v16 = vadd.f32 %v2457_v17, %v801_v14  ;;  %v930_v18 = vadd.f32 %v2457_v17, %v929_v15 }
 0x133   : > { %v803_v19 = vpop.f32.mrf.mxu0  ;;  %v931_v20 = vpop.f32.mrf.mxu1 }
 0x134   : > { %v1036_v23 = vmax.f32 %v802_v16, 0.0  ;;  %v1068_v24 = vmax.f32 %v930_v18, 0.0 }
 0x135   : > { %v806_v25 = vpop.f32.mrf.mxu0  ;;  %v934_v26 = vpop.f32.mrf.mxu1 }
 0x136   : > { %v1772_v27 = vpack.c.bf16 %v1036_v23, %v1035_v21  ;;  %v1852_v28 = vpack.c.bf16 %v1068_v24, %v1067_v22  ;;  %v807_v31 = vadd.f32 %v2457_v17, %v806_v25  ;;  %v935_v32 = vadd.f32 %v2457_v17, %v934_v26 }
 0x137   : > { %v808_v29 = vpop.f32.mrf.mxu0  ;;  %v936_v30 = vpop.f32.mrf.mxu1 }
 0x138   : > { %1916 = vst [vmem:[%s2466_s6 + $0x18] sm:$0xff] %v1772_v27   ;;  %1932 = vst [vmem:[%s2466_s6 + $0x98] sm:$0xff] %v1852_v28   ;;  %v1037_v39 = vmax.f32 %v807_v31, 0.0  ;;  %v1069_v40 = vmax.f32 %v935_v32, 0.0 }
 0x139   : > { %v809_v33 = vpop.f32.mrf.mxu0  ;;  %v937_v34 = vpop.f32.mrf.mxu1 }
 0x13a   : > { %v810_v35 = vadd.f32 %v2457_v17, %v809_v33  ;;  %v938_v36 = vadd.f32 %v2457_v17, %v937_v34 }
 0x13b   : > { %v811_v37 = vpop.f32.mrf.mxu0  ;;  %v939_v38 = vpop.f32.mrf.mxu1 }
 0x13c   : > { %v1038_v41 = vmax.f32 %v810_v35, 0.0  ;;  %v1070_v42 = vmax.f32 %v938_v36, 0.0 }
 0x13d   : > { %v814_v43 = vpop.f32.mrf.mxu0  ;;  %v942_v44 = vpop.f32.mrf.mxu1 }
 0x13e   : > { %v1777_v45 = vpack.c.bf16 %v1038_v41, %v1037_v39  ;;  %v1857_v46 = vpack.c.bf16 %v1070_v42, %v1069_v40  ;;  %v815_v49 = vadd.f32 %v2457_v17, %v814_v43  ;;  %v943_v50 = vadd.f32 %v2457_v17, %v942_v44 }
 0x13f   : > { %v816_v47 = vpop.f32.mrf.mxu0  ;;  %v944_v48 = vpop.f32.mrf.mxu1 }
 0x140   : > { %1917 = vst [vmem:[%s2466_s6 + $0x20] sm:$0xff] %v1777_v45   ;;  %1933 = vst [vmem:[%s2466_s6 + $0xa0] sm:$0xff] %v1857_v46   ;;  %v1039_v57 = vmax.f32 %v815_v49, 0.0  ;;  %v1071_v58 = vmax.f32 %v943_v50, 0.0 }
 0x141   : > { %v817_v51 = vpop.f32.mrf.mxu0  ;;  %v945_v52 = vpop.f32.mrf.mxu1 }
 0x142   : > { %v818_v53 = vadd.f32 %v2457_v17, %v817_v51  ;;  %v946_v54 = vadd.f32 %v2457_v17, %v945_v52 }
 0x143   : > { %v819_v55 = vpop.f32.mrf.mxu0  ;;  %v947_v56 = vpop.f32.mrf.mxu1 }
 0x144   : > { %v1040_v59 = vmax.f32 %v818_v53, 0.0  ;;  %v1072_v60 = vmax.f32 %v946_v54, 0.0 }
 0x145   : > { %v822_v61 = vpop.f32.mrf.mxu0  ;;  %v950_v62 = vpop.f32.mrf.mxu1 }
 0x146   : > { %v1782_v63 = vpack.c.bf16 %v1040_v59, %v1039_v57  ;;  %v1862_v0 = vpack.c.bf16 %v1072_v60, %v1071_v58  ;;  %v823_v3 = vadd.f32 %v2457_v17, %v822_v61  ;;  %v951_v4 = vadd.f32 %v2457_v17, %v950_v62 }
 0x147   : > { %v824_v1 = vpop.f32.mrf.mxu0  ;;  %v952_v2 = vpop.f32.mrf.mxu1 }
 0x148   : > { %1918 = vst [vmem:[%s2466_s6 + $0x28] sm:$0xff] %v1782_v63   ;;  %1934 = vst [vmem:[%s2466_s6 + $0xa8] sm:$0xff] %v1862_v0   ;;  %v1041_v11 = vmax.f32 %v823_v3, 0.0  ;;  %v1073_v12 = vmax.f32 %v951_v4, 0.0 }
 0x149   : > { %v825_v5 = vpop.f32.mrf.mxu0  ;;  %v953_v6 = vpop.f32.mrf.mxu1 }
 0x14a   : > { %v826_v7 = vadd.f32 %v2457_v17, %v825_v5  ;;  %v954_v8 = vadd.f32 %v2457_v17, %v953_v6 }
 0x14b   : > { %v827_v9 = vpop.f32.mrf.mxu0  ;;  %v955_v10 = vpop.f32.mrf.mxu1 }
 0x14c   : > { %v1042_v13 = vmax.f32 %v826_v7, 0.0  ;;  %v1074_v14 = vmax.f32 %v954_v8, 0.0 }
 0x14d   : > { %v830_v15 = vpop.f32.mrf.mxu0  ;;  %v958_v16 = vpop.f32.mrf.mxu1 }
 0x14e   : > { %v1787_v18 = vpack.c.bf16 %v1042_v13, %v1041_v11  ;;  %v1867_v19 = vpack.c.bf16 %v1074_v14, %v1073_v12  ;;  %v831_v22 = vadd.f32 %v2457_v17, %v830_v15  ;;  %v959_v23 = vadd.f32 %v2457_v17, %v958_v16 }
 0x14f   : > { %v832_v20 = vpop.f32.mrf.mxu0  ;;  %v960_v21 = vpop.f32.mrf.mxu1 }
 0x150   : > { %1919 = vst [vmem:[%s2466_s6 + $0x30] sm:$0xff] %v1787_v18   ;;  %1935 = vst [vmem:[%s2466_s6 + $0xb0] sm:$0xff] %v1867_v19   ;;  %v1043_v30 = vmax.f32 %v831_v22, 0.0  ;;  %v1075_v31 = vmax.f32 %v959_v23, 0.0 }
 0x151   : > { %v833_v24 = vpop.f32.mrf.mxu0  ;;  %v961_v25 = vpop.f32.mrf.mxu1 }
 0x152   : > { %v834_v26 = vadd.f32 %v2457_v17, %v833_v24  ;;  %v962_v27 = vadd.f32 %v2457_v17, %v961_v25 }
 0x153   : > { %v835_v28 = vpop.f32.mrf.mxu0  ;;  %v963_v29 = vpop.f32.mrf.mxu1 }
 0x154   : > { %v1044_v32 = vmax.f32 %v834_v26, 0.0  ;;  %v1076_v33 = vmax.f32 %v962_v27, 0.0 }
 0x155   : > { %v838_v34 = vpop.f32.mrf.mxu0  ;;  %v966_v35 = vpop.f32.mrf.mxu1 }
 0x156   : > { %v1792_v36 = vpack.c.bf16 %v1044_v32, %v1043_v30  ;;  %v1872_v37 = vpack.c.bf16 %v1076_v33, %v1075_v31  ;;  %v839_v40 = vadd.f32 %v2457_v17, %v838_v34  ;;  %v967_v41 = vadd.f32 %v2457_v17, %v966_v35 }
 0x157   : > { %v840_v38 = vpop.f32.mrf.mxu0  ;;  %v968_v39 = vpop.f32.mrf.mxu1 }
 0x158   : > { %1920 = vst [vmem:[%s2466_s6 + $0x38] sm:$0xff] %v1792_v36   ;;  %1936 = vst [vmem:[%s2466_s6 + $0xb8] sm:$0xff] %v1872_v37   ;;  %v1045_v48 = vmax.f32 %v839_v40, 0.0  ;;  %v1077_v49 = vmax.f32 %v967_v41, 0.0 }
 0x159   : > { %v841_v42 = vpop.f32.mrf.mxu0  ;;  %v969_v43 = vpop.f32.mrf.mxu1 }
 0x15a   : > { %v842_v44 = vadd.f32 %v2457_v17, %v841_v42  ;;  %v970_v45 = vadd.f32 %v2457_v17, %v969_v43 }
 0x15b   : > { %v843_v46 = vpop.f32.mrf.mxu0  ;;  %v971_v47 = vpop.f32.mrf.mxu1 }
 0x15c   : > { %v1046_v50 = vmax.f32 %v842_v44, 0.0  ;;  %v1078_v51 = vmax.f32 %v970_v45, 0.0 }
 0x15d   : > { %v846_v52 = vpop.f32.mrf.mxu0  ;;  %v974_v53 = vpop.f32.mrf.mxu1 }
 0x15e   : > { %v1797_v54 = vpack.c.bf16 %v1046_v50, %v1045_v48  ;;  %v1877_v55 = vpack.c.bf16 %v1078_v51, %v1077_v49  ;;  %v847_v58 = vadd.f32 %v2457_v17, %v846_v52  ;;  %v975_v59 = vadd.f32 %v2457_v17, %v974_v53 }
 0x15f   : > { %v848_v56 = vpop.f32.mrf.mxu0  ;;  %v976_v57 = vpop.f32.mrf.mxu1 }
 0x160   : > { %1921 = vst [vmem:[%s2466_s6 + $0x40] sm:$0xff] %v1797_v54   ;;  %1937 = vst [vmem:[%s2466_s6 + $0xc0] sm:$0xff] %v1877_v55   ;;  %v1047_v2 = vmax.f32 %v847_v58, 0.0  ;;  %v1079_v3 = vmax.f32 %v975_v59, 0.0 }
 0x161   : > { %v849_v60 = vpop.f32.mrf.mxu0  ;;  %v977_v61 = vpop.f32.mrf.mxu1 }
 0x162   : > { %v850_v62 = vadd.f32 %v2457_v17, %v849_v60  ;;  %v978_v63 = vadd.f32 %v2457_v17, %v977_v61 }
 0x163   : > { %v851_v0 = vpop.f32.mrf.mxu0  ;;  %v979_v1 = vpop.f32.mrf.mxu1 }
 0x164   : > { %v1048_v4 = vmax.f32 %v850_v62, 0.0  ;;  %v1080_v5 = vmax.f32 %v978_v63, 0.0 }
 0x165   : > { %v854_v6 = vpop.f32.mrf.mxu0  ;;  %v982_v7 = vpop.f32.mrf.mxu1 }
 0x166   : > { %v1802_v8 = vpack.c.bf16 %v1048_v4, %v1047_v2  ;;  %v1882_v9 = vpack.c.bf16 %v1080_v5, %v1079_v3  ;;  %v855_v12 = vadd.f32 %v2457_v17, %v854_v6  ;;  %v983_v13 = vadd.f32 %v2457_v17, %v982_v7 }
 0x167   : > { %v856_v10 = vpop.f32.mrf.mxu0  ;;  %v984_v11 = vpop.f32.mrf.mxu1 }
 0x168   : > { %1922 = vst [vmem:[%s2466_s6 + $0x48] sm:$0xff] %v1802_v8   ;;  %1938 = vst [vmem:[%s2466_s6 + $0xc8] sm:$0xff] %v1882_v9   ;;  %v1049_v21 = vmax.f32 %v855_v12, 0.0  ;;  %v1081_v22 = vmax.f32 %v983_v13, 0.0 }
 0x169   : > { %v857_v14 = vpop.f32.mrf.mxu0  ;;  %v985_v15 = vpop.f32.mrf.mxu1 }
 0x16a   : > { %v858_v16 = vadd.f32 %v2457_v17, %v857_v14  ;;  %v986_v18 = vadd.f32 %v2457_v17, %v985_v15 }
 0x16b   : > { %v859_v19 = vpop.f32.mrf.mxu0  ;;  %v987_v20 = vpop.f32.mrf.mxu1 }
 0x16c   : > { %v1050_v23 = vmax.f32 %v858_v16, 0.0  ;;  %v1082_v24 = vmax.f32 %v986_v18, 0.0 }
 0x16d   : > { %v862_v25 = vpop.f32.mrf.mxu0  ;;  %v990_v26 = vpop.f32.mrf.mxu1 }
 0x16e   : > { %v1807_v27 = vpack.c.bf16 %v1050_v23, %v1049_v21  ;;  %v1887_v28 = vpack.c.bf16 %v1082_v24, %v1081_v22  ;;  %v863_v31 = vadd.f32 %v2457_v17, %v862_v25  ;;  %v991_v32 = vadd.f32 %v2457_v17, %v990_v26 }
 0x16f   : > { %v864_v29 = vpop.f32.mrf.mxu0  ;;  %v992_v30 = vpop.f32.mrf.mxu1 }
 0x170   : > { %1923 = vst [vmem:[%s2466_s6 + $0x50] sm:$0xff] %v1807_v27   ;;  %1939 = vst [vmem:[%s2466_s6 + $0xd0] sm:$0xff] %v1887_v28   ;;  %v1051_v39 = vmax.f32 %v863_v31, 0.0  ;;  %v1083_v40 = vmax.f32 %v991_v32, 0.0 }
 0x171   : > { %v865_v33 = vpop.f32.mrf.mxu0  ;;  %v993_v34 = vpop.f32.mrf.mxu1 }
 0x172   : > { %v866_v35 = vadd.f32 %v2457_v17, %v865_v33  ;;  %v994_v36 = vadd.f32 %v2457_v17, %v993_v34 }
 0x173   : > { %v867_v37 = vpop.f32.mrf.mxu0  ;;  %v995_v38 = vpop.f32.mrf.mxu1 }
 0x174   : > { %v1052_v41 = vmax.f32 %v866_v35, 0.0  ;;  %v1084_v42 = vmax.f32 %v994_v36, 0.0 }
 0x175   : > { %v870_v43 = vpop.f32.mrf.mxu0  ;;  %v998_v44 = vpop.f32.mrf.mxu1 }
 0x176   : > { %v1812_v45 = vpack.c.bf16 %v1052_v41, %v1051_v39  ;;  %v1892_v46 = vpack.c.bf16 %v1084_v42, %v1083_v40  ;;  %v871_v49 = vadd.f32 %v2457_v17, %v870_v43  ;;  %v999_v50 = vadd.f32 %v2457_v17, %v998_v44 }
 0x177   : > { %v872_v47 = vpop.f32.mrf.mxu0  ;;  %v1000_v48 = vpop.f32.mrf.mxu1 }
 0x178   : > { %1924 = vst [vmem:[%s2466_s6 + $0x58] sm:$0xff] %v1812_v45   ;;  %1940 = vst [vmem:[%s2466_s6 + $0xd8] sm:$0xff] %v1892_v46   ;;  %v1053_v57 = vmax.f32 %v871_v49, 0.0  ;;  %v1085_v58 = vmax.f32 %v999_v50, 0.0 }
 0x179   : > { %v873_v51 = vpop.f32.mrf.mxu0  ;;  %v1001_v52 = vpop.f32.mrf.mxu1 }
 0x17a   : > { %v874_v53 = vadd.f32 %v2457_v17, %v873_v51  ;;  %v1002_v54 = vadd.f32 %v2457_v17, %v1001_v52 }
 0x17b   : > { %v875_v55 = vpop.f32.mrf.mxu0  ;;  %v1003_v56 = vpop.f32.mrf.mxu1 }
 0x17c   : > { %v1054_v59 = vmax.f32 %v874_v53, 0.0  ;;  %v1086_v60 = vmax.f32 %v1002_v54, 0.0 }
 0x17d   : > { %v878_v61 = vpop.f32.mrf.mxu0  ;;  %v1006_v62 = vpop.f32.mrf.mxu1 }
 0x17e   : > { %v1817_v63 = vpack.c.bf16 %v1054_v59, %v1053_v57  ;;  %v1897_v0 = vpack.c.bf16 %v1086_v60, %v1085_v58  ;;  %v879_v3 = vadd.f32 %v2457_v17, %v878_v61  ;;  %v1007_v4 = vadd.f32 %v2457_v17, %v1006_v62 }
 0x17f   : > { %v880_v1 = vpop.f32.mrf.mxu0  ;;  %v1008_v2 = vpop.f32.mrf.mxu1 }
 0x180   : > { %1925 = vst [vmem:[%s2466_s6 + $0x60] sm:$0xff] %v1817_v63   ;;  %1941 = vst [vmem:[%s2466_s6 + $0xe0] sm:$0xff] %v1897_v0   ;;  %v1055_v11 = vmax.f32 %v879_v3, 0.0  ;;  %v1087_v12 = vmax.f32 %v1007_v4, 0.0 }
 0x181   : > { %v881_v5 = vpop.f32.mrf.mxu0  ;;  %v1009_v6 = vpop.f32.mrf.mxu1 }
 0x182   : > { %v882_v7 = vadd.f32 %v2457_v17, %v881_v5  ;;  %v1010_v8 = vadd.f32 %v2457_v17, %v1009_v6 }
 0x183   : > { %v883_v9 = vpop.f32.mrf.mxu0  ;;  %v1011_v10 = vpop.f32.mrf.mxu1 }
 0x184   : > { %v1056_v13 = vmax.f32 %v882_v7, 0.0  ;;  %v1088_v14 = vmax.f32 %v1010_v8, 0.0 }
 0x185   : > { %v886_v15 = vpop.f32.mrf.mxu0  ;;  %v1014_v16 = vpop.f32.mrf.mxu1 }
 0x186   : > { %v1822_v18 = vpack.c.bf16 %v1056_v13, %v1055_v11  ;;  %v1902_v19 = vpack.c.bf16 %v1088_v14, %v1087_v12  ;;  %v887_v22 = vadd.f32 %v2457_v17, %v886_v15  ;;  %v1015_v23 = vadd.f32 %v2457_v17, %v1014_v16 }
 0x187   : > { %v888_v20 = vpop.f32.mrf.mxu0  ;;  %v1016_v21 = vpop.f32.mrf.mxu1 }
 0x188   : > { %1926 = vst [vmem:[%s2466_s6 + $0x68] sm:$0xff] %v1822_v18   ;;  %1942 = vst [vmem:[%s2466_s6 + $0xe8] sm:$0xff] %v1902_v19   ;;  %v1057_v30 = vmax.f32 %v887_v22, 0.0  ;;  %v1089_v31 = vmax.f32 %v1015_v23, 0.0 }
 0x189   : > { %v889_v24 = vpop.f32.mrf.mxu0  ;;  %v1017_v25 = vpop.f32.mrf.mxu1 }
 0x18a   : > { %v890_v26 = vadd.f32 %v2457_v17, %v889_v24  ;;  %v1018_v27 = vadd.f32 %v2457_v17, %v1017_v25 }
 0x18b   : > { %v891_v28 = vpop.f32.mrf.mxu0  ;;  %v1019_v29 = vpop.f32.mrf.mxu1 }
 0x18c   : > { %v1058_v32 = vmax.f32 %v890_v26, 0.0  ;;  %v1090_v33 = vmax.f32 %v1018_v27, 0.0 }
 0x18d   : > { %v894_v34 = vpop.f32.mrf.mxu0  ;;  %v1022_v35 = vpop.f32.mrf.mxu1 }
 0x18e   : > { %v1827_v36 = vpack.c.bf16 %v1058_v32, %v1057_v30  ;;  %v1907_v37 = vpack.c.bf16 %v1090_v33, %v1089_v31  ;;  %v895_v40 = vadd.f32 %v2457_v17, %v894_v34  ;;  %v1023_v41 = vadd.f32 %v2457_v17, %v1022_v35 }
 0x18f   : > { %v896_v38 = vpop.f32.mrf.mxu0  ;;  %v1024_v39 = vpop.f32.mrf.mxu1 }
 0x190   : > { %1927 = vst [vmem:[%s2466_s6 + $0x70] sm:$0xff] %v1827_v36   ;;  %1943 = vst [vmem:[%s2466_s6 + $0xf0] sm:$0xff] %v1907_v37   ;;  %v1059_v48 = vmax.f32 %v895_v40, 0.0  ;;  %v1091_v49 = vmax.f32 %v1023_v41, 0.0 }
 0x191   : > { %v897_v42 = vpop.f32.mrf.mxu0  ;;  %v1025_v43 = vpop.f32.mrf.mxu1 }
 0x192   : > { %v898_v44 = vadd.f32 %v2457_v17, %v897_v42  ;;  %v1026_v45 = vadd.f32 %v2457_v17, %v1025_v43 }
 0x193   : > { %v899_v46 = vpop.f32.mrf.mxu0  ;;  %v1027_v47 = vpop.f32.mrf.mxu1 }
 0x194   : > { %v1060_v50 = vmax.f32 %v898_v44, 0.0  ;;  %v1092_v51 = vmax.f32 %v1026_v45, 0.0 }
 0x196   : > { %v1832_v17 = vpack.c.bf16 %v1060_v50, %v1059_v48  ;;  %v1912_v52 = vpack.c.bf16 %v1092_v51, %v1091_v49 }
 0x198   : > { %1928 = vst [vmem:[%s2466_s6 + $0x78] sm:$0xff] %v1832_v17   ;;  %1944 = vst [vmem:[%s2466_s6 + $0xf8] sm:$0xff] %v1912_v52  }
 0x199   : > { %2160 = shalt.err (!%p2157_p5)
}
 0x19a   : > { %s2161_s27 = scalar_lea.hbm %s2563_s11, 4096  ;;  %s2165_s30 = scalar_lea.hbm %s2619_s3, 8192 }
 0x19b   : > { %p2162_p6 = scmp.ne.s32.totalorder %s2563_s11, %s2161_s27  ;;  %p2166_p10 = scmp.lt.s32.totalorder %s2563_s11, %s2619_s3 }
 0x19c   : > { %p2167_p11 = scmp.lt.s32.totalorder %s2165_s30, %s2161_s27 }
 0x19d   : > { %p2163_p7 = pnand %p2162_p6, %p2289_p4 }
 0x19e   : > { %p2168_p12 = por %p2167_p11, %p2166_p10 }
 0x19f   : > { %p2164_p9 = pneg %p2163_p7 }
 0x1a1   : > { %p2169_p13 = pnand %p2168_p12, %p2164_p9 }
 0x1a3   : > { %2172 = shalt.err (!%p2169_p13)
}
 0x1a4   : > { %s2227_s19 = smov 64   ;;  %s2228_s6 = smov 4  }
 0x1a5   : > { %1977 = dma.vmem_to_hbm [thread:$0]  (%p2289_p4), %s2565_s8, 4096, %s2563_s11, %s2571_s15, %s2227_s19, %s2227_s19, %s2228_s6  }
 0x1a6 PF: > { %p1983_p0 = scmp.ge.s32.totalorder %s2223_s17, 2  ;;  %s1443_s7 = sand.u32 1, %s2203_s12  }
 0x1a7   : > { %s1444_s9 = scalar_lea.sflag [#allocation3], %s1443_s7 }
 0x1a8   : > { %p1980_p1 = pnand %p1983_p0, %p2296_p8 }
 0x1aa   : > { %p1981_p2 = pneg %p1980_p1 }
 0x1ac   : > { %2198 = dma.done.wait (%p1981_p2), %s1444_s9, 4096  }
 0x1ad   : > { %2200 = vsyncadd (%p1981_p2), %s1444_s9, 4294963200  ;;  %s16_s17 = sadd.s32 1, %s2223_s17   ;;  %s2622_s12 = smov %s2207_s13 }
 0x1ae   : > { %p13_p3 = scmp.ge.s32.totalorder %s16_s17, 4   ;;  %s2623_s13 = smov %s2211_s14 }
 0x1af   : > { %s2624_s14 = smov %s2302_s25  ;;  %s2625_s15 = smov %s2219_s16 }
 0x1b0   : > { %s2626_s16 = smov %s2628_s20  ;;  %15 = sbr.rel (!%p13_p3) target bundleno = 4 (0x4), region = 73 }
 0x1b5   :  { %1449 = vsyncpa [#allocation3], 1 }
 0x1b6   :  { %1451 = vsyncpa [#allocation3 + $0x1], 1 }

</bundles_post_ra>
